<compile_context>
chip_gen: v7x
topology: tpu7x:2x2x1
jax: 0.10.0
libtpu: 0.0.40
codegen_flags: <defaults>
</compile_context>

<pallas_src>
import functools

import jax
import jax.numpy as jnp
from jax.experimental import pallas as pl
from jax.experimental.pallas import tpu as pltpu

EPS = 1e-6        # sample_factory EPS used for should_sub_mean / should_scale checks
RMS_EPS = 1e-5    # RunningMeanStdInPlace epsilon
RMS_CLIP = 5.0    # RunningMeanStdInPlace clamp


def _rms_affine_kernel(x_ref, a_ref, b_ref, o_ref):
    # Full path folded into one fused multiply-add + clip:
    #   o = clip(((x - sub_mean)/scale - mean) / sqrt(var + eps), -5, 5) = clip(x*a + b, .)
    x = x_ref[...].astype(jnp.float32)
    o_ref[...] = jnp.clip(x * a_ref[...] + b_ref[...], -RMS_CLIP, RMS_CLIP)


def _scalar_affine_kernel(x_ref, o_ref, *, scale, bias):
    # normalize_input=False path: scalar affine only, no running-stat DMA, no clip.
    x = x_ref[...].astype(jnp.float32)
    o_ref[...] = x * jnp.float32(scale) + jnp.float32(bias)


def _pick_block_rows(batch, feat, in_itemsize):
    """Rows per tile: ~2 MiB f32 output tile, rounded to the sublane-packing multiple."""
    sub = max(8, 32 // max(1, in_itemsize))               # f32:8, bf16:16, int8/uint8:32
    target = max(1, (2 * 1024 * 1024) // max(1, feat * 4))
    tb = max(sub, (target // sub) * sub)
    # A full-batch block is always layout-legal (block dim == array dim).
    return batch if tb >= batch else tb


def _compiler_params():
    return pltpu.CompilerParams(
        dimension_semantics=("parallel",),        # shard batch grid across v7x's 2 TCs
        vmem_limit_bytes=32 * 1024 * 1024,        # explicit; tiles sized well under this
    )


def observation_normalizer(obs_dict, *, sub_mean, scale, running_mean=None,
                           running_var=None, normalize_input=True):
    """Functional equivalent of ObservationNormalizer.forward for the 'obs' key.

    obs_dict['obs']: (B, C, H, W) tensor (uint8 / bf16 / f32 all fine; cast in-kernel).
    running_mean / running_var: (C, H, W) float32 buffers (per_channel=False layout).
    Returns a *new* dict (the PyTorch module clones) with float32 normalized obs.
    """
    should_sub_mean = abs(sub_mean) > EPS
    should_scale = abs(scale - 1.0) > EPS
    use_rms = normalize_input
    if not (should_sub_mean or should_scale or use_rms):
        return obs_dict  # module returns the input dict untouched

    x = obs_dict["obs"]
    B = x.shape[0]
    D = 1
    for s in x.shape[1:]:
        D *= s

    # Keep the narrow source dtype on the read side; reshape is layout-free.
    x2d = x.reshape(B, D)
    in_itemsize = jnp.dtype(x.dtype).itemsize
    tb = _pick_block_rows(B, D, in_itemsize)
    grid = (pl.cdiv(B, tb),)

    inv_scale = (1.0 / float(scale)) if should_scale else 1.0
    sub = float(sub_mean) if should_sub_mean else 0.0

    x_spec = pl.BlockSpec((tb, D), lambda i: (i, 0))
    o_spec = pl.BlockSpec((tb, D), lambda i: (i, 0))
    out_shape = jax.ShapeDtypeStruct((B, D), jnp.float32)

    if use_rms:
        # Wrapper-side fold (O(D) once per call, not per element):
        #   a = inv_scale / sqrt(var + eps)
        #   b = (-sub_mean*inv_scale - mean) / sqrt(var + eps)
        inv_std = 1.0 / jnp.sqrt(running_var.astype(jnp.float32).reshape(1, D) + RMS_EPS)
        mean = running_mean.astype(jnp.float32).reshape(1, D)
        a = inv_scale * inv_std
        b = (-sub * inv_scale - mean) * inv_std
        stat_spec = pl.BlockSpec((1, D), lambda i: (0, 0))   # VMEM-resident across steps
        cost = pl.CostEstimate(
            flops=3 * B * D,
            transcendentals=0,
            bytes_accessed=B * D * (in_itemsize + 4) + 8 * D,
        )
        out2d = pl.pallas_call(
            _rms_affine_kernel,
            out_shape=out_shape,
            grid=grid,
            in_specs=[x_spec, stat_spec, stat_spec],
            out_specs=o_spec,
            compiler_params=_compiler_params(),
            cost_estimate=cost,
        )(x2d, a, b)
    else:
        kernel = functools.partial(
            _scalar_affine_kernel, scale=inv_scale, bias=-sub * inv_scale)
        cost = pl.CostEstimate(
            flops=2 * B * D,
            transcendentals=0,
            bytes_accessed=B * D * (in_itemsize + 4),
        )
        out2d = pl.pallas_call(
            kernel,
            out_shape=out_shape,
            grid=grid,
            in_specs=[x_spec],
            out_specs=o_spec,
            compiler_params=_compiler_params(),
            cost_estimate=cost,
        )(x2d)

    # The PyTorch module clones every dict entry and casts to float.
    out = {}
    for k, v in obs_dict.items():
        out[k] = out2d.reshape(x.shape) if k == "obs" else jnp.asarray(v).astype(jnp.float32)
    return out


# ----------------------------- references (pure JAX) -----------------------------

def _reference_rms(x, sub_mean, scale, running_mean, running_var):
    y = x.astype(jnp.float32)
    if abs(sub_mean) > EPS:
        y = y - sub_mean
    if abs(scale - 1.0) > EPS:
        y = y * (1.0 / scale)
    y = (y - running_mean[None]) / jnp.sqrt(running_var[None] + RMS_EPS)
    return jnp.clip(y, -RMS_CLIP, RMS_CLIP)


def _reference_affine(x, sub_mean, scale):
    y = x.astype(jnp.float32)
    if abs(sub_mean) > EPS:
        y = y - sub_mean
    if abs(scale - 1.0) > EPS:
        y = y * (1.0 / scale)
    return y


if __name__ == "__main__":
    key = jax.random.PRNGKey(0)
    k_obs, k_mean, k_var = jax.random.split(key, 3)

    B, C, H, W = 2, 4, 16, 16           # D = 1024 -> lane-dense output (multiple of 128)
    sub_mean, scale = 128.0, 128.0      # cfg.obs_subtract_mean / cfg.obs_scale

    # uint8 pixel observations: kernel reads the narrow dtype from HBM, casts in VMEM.
    x_u8 = (jax.random.uniform(k_obs, (B, C, H, W), dtype=jnp.float32) * 255.0
            ).astype(jnp.uint8)
    running_mean = jax.random.uniform(k_mean, (C, H, W), dtype=jnp.float32) * 10.0
    running_var = jax.random.uniform(k_var, (C, H, W), dtype=jnp.float32) + 0.5

    # Path 1: sub_mean + scale + running-mean-std normalization + clip.
    out = observation_normalizer(
        {"obs": x_u8}, sub_mean=sub_mean, scale=scale,
        running_mean=running_mean, running_var=running_var, normalize_input=True)
    y = jax.block_until_ready(out["obs"])
    ref = _reference_rms(x_u8, sub_mean, scale, running_mean, running_var)
    assert y.shape == (B, C, H, W) and y.dtype == jnp.float32
    assert jnp.allclose(y, ref, atol=2e-5, rtol=1e-5), "RMS path mismatch vs reference"

    # Path 2: normalize_input=False -> scalar affine only (no stats DMA, no clip).
    x_f32 = jax.random.uniform(k_obs, (B, C, H, W), dtype=jnp.float32) * 255.0
    out2 = observation_normalizer(
        {"obs": x_f32}, sub_mean=sub_mean, scale=scale, normalize_input=False)
    y2 = jax.block_until_ready(out2["obs"])
    ref2 = _reference_affine(x_f32, sub_mean, scale)
    assert y2.shape == (B, C, H, W) and y2.dtype == jnp.float32
    assert jnp.allclose(y2, ref2, atol=2e-5, rtol=1e-5), "affine path mismatch vs reference"

    print("KERNEL_OK")
</pallas_src>

<mosaic_0001>
module attributes {stable_mosaic.version = 11 : i64} {
  func.func @_rms_affine_kernel(%arg0: i32, %arg1: memref<2x1024xi8, #tpu.memory_space<vmem>>, %arg2: memref<1x1024xf32, #tpu.memory_space<vmem>>, %arg3: memref<1x1024xf32, #tpu.memory_space<vmem>>, %arg4: memref<2x1024xf32, #tpu.memory_space<vmem>>) attributes {dimension_semantics = [#tpu.dimension_semantics<parallel>], iteration_bounds = array<i64: 1>, scalar_prefetch = 0 : i64, scratch_operands = 0 : i64, tpu.core_type = #tpu.core_type<tc>, window_params = [{transform_indices = @transform_0, window_bounds = array<i64: 2, 1024>}, {pipeline_mode = #tpu.pipeline_mode<synchronous>, transform_indices = @transform_1, window_bounds = array<i64: 1, 1024>}, {pipeline_mode = #tpu.pipeline_mode<synchronous>, transform_indices = @transform_2, window_bounds = array<i64: 1, 1024>}, {transform_indices = @transform_3, window_bounds = array<i64: 2, 1024>}]} {
    %c0 = arith.constant 0 : index
    %c0_0 = arith.constant 0 : index
    %0 = vector.load %arg1[%c0, %c0_0] : memref<2x1024xi8, #tpu.memory_space<vmem>>, vector<2x1024xi8>
    %1 = arith.uitofp %0 : vector<2x1024xi8> to vector<2x1024xf32>
    %c0_1 = arith.constant 0 : index
    %c0_2 = arith.constant 0 : index
    %2 = vector.load %arg2[%c0_1, %c0_2] : memref<1x1024xf32, #tpu.memory_space<vmem>>, vector<1x1024xf32>
    %3 = vector.broadcast %2 : vector<1x1024xf32> to vector<2x1024xf32>
    %4 = arith.mulf %1, %3 : vector<2x1024xf32>
    %c0_3 = arith.constant 0 : index
    %c0_4 = arith.constant 0 : index
    %5 = vector.load %arg3[%c0_3, %c0_4] : memref<1x1024xf32, #tpu.memory_space<vmem>>, vector<1x1024xf32>
    %6 = vector.broadcast %5 : vector<1x1024xf32> to vector<2x1024xf32>
    %7 = arith.addf %4, %6 : vector<2x1024xf32>
    %cst = arith.constant -5.000000e+00 : f32
    %cst_5 = arith.constant 5.000000e+00 : f32
    %8 = vector.broadcast %cst : f32 to vector<2x1024xf32>
    %9 = arith.maximumf %8, %7 : vector<2x1024xf32>
    %10 = vector.broadcast %cst_5 : f32 to vector<2x1024xf32>
    %11 = arith.minimumf %10, %9 : vector<2x1024xf32>
    %c0_6 = arith.constant 0 : index
    %c0_7 = arith.constant 0 : index
    %12 = vector.load %arg4[%c0_6, %c0_7] : memref<2x1024xf32, #tpu.memory_space<vmem>>, vector<2x1024xf32>
    tpu.vector_store %arg4[%c0_6, %c0_7], %11 {strides = array<i32>} : memref<2x1024xf32, #tpu.memory_space<vmem>>, vector<2x1024xf32>,
    return
  }
  func.func @transform_0(%arg0: i32) -> (i32, i32) {
    %c0_i32 = arith.constant 0 : i32
    %c0_i32_0 = arith.constant 0 : i32
    return %arg0, %c0_i32 : i32, i32
  }
  func.func @transform_1(%arg0: i32) -> (i32, i32) {
    %c0_i32 = arith.constant 0 : i32
    %c0_i32_0 = arith.constant 0 : i32
    %c0_i32_1 = arith.constant 0 : i32
    return %c0_i32, %c0_i32_0 : i32, i32
  }
  func.func @transform_2(%arg0: i32) -> (i32, i32) {
    %c0_i32 = arith.constant 0 : i32
    %c0_i32_0 = arith.constant 0 : i32
    %c0_i32_1 = arith.constant 0 : i32
    return %c0_i32, %c0_i32_0 : i32, i32
  }
  func.func @transform_3(%arg0: i32) -> (i32, i32) {
    %c0_i32 = arith.constant 0 : i32
    %c0_i32_0 = arith.constant 0 : i32
    return %arg0, %c0_i32 : i32, i32
  }
}

</mosaic_0001>

<bundles_post_ra>
// kernel: tpu_custom_call.1
= control target key start
LH: loop header
LB: loop body
LE: loop exit
PB: predicated region body
PF: predicated region fallthrough
CT: control target
= control target key end

     0   :  { %8 = vsyncpa [#allocation3], 0  ;;  %s393_s0 = inlined_call_operand.hbm [shape: u8[2,1024], index: 0, kind: input, shape index: {}]   ;;  %s394_s1 = inlined_call_operand.hbm [shape: f32[1,1024], index: 1, kind: input, shape index: {}]   ;;  %s395_s2 = inlined_call_operand.hbm [shape: f32[1,1024], index: 2, kind: input, shape index: {}]   ;;  %s396_s3 = inlined_call_operand.hbm [shape: f32[2,1024], index: 3, kind: output, shape index: {}]  }
   0x1   :  { %9 = vsyncpa [#allocation6], 0 }
   0x2   :  { %10 = vsyncpa [#allocation4], 0  ;;  %s320_s12 = smov [#allocation5]   ;;  %s321_s14 = smov [#allocation2]  }
   0x3   :  { %s27_s13 = sshll.u32 %s320_s12, 4  ;;  %s17_s15 = sshll.u32 %s321_s14, 4  ;;  %s28_s13 = int_to_ptr.vmem [resolvable:$true] %s27_s13  ;;  %s18_s15 = int_to_ptr.vmem [resolvable:$true] %s17_s15 }
   0x4   :  { %s226_s18 = scalar_lea.hbm %s394_s1, 128 }
   0x5   :  { %p227_p0 = scmp.ne.s32.totalorder %s394_s1, %s226_s18  ;;  %p230_p1 = scmp.lt.u32.totalorder %s226_s18, %s394_s1 }
   0x7   :  { %p232_p2 = pnand %p230_p1, %p227_p0 }
   0x9   :  { %235 = shalt.err (!%p232_p2)
}
   0xa   :  { %s236_s23 = scalar_lea.vmem %s28_s13, 128  ;;  %p241_p4 = scmp.lt.s32.totalorder %s28_s13, %s28_s13 }
   0xb   :  { %p237_p3 = scmp.ne.s32.totalorder %s28_s13, %s236_s23  ;;  %p242_p5 = scmp.lt.s32.totalorder %s236_s23, %s236_s23 }
   0xd   :  { %p243_p6 = por %p242_p5, %p241_p4 }
   0xf   :  { %p244_p7 = pnand %p243_p6, %p237_p3 }
  0x11   :  { %247 = shalt.err (!%p244_p7)
}
  0x12   :  { %30 = dma.hbm_to_vmem [thread:$0]  %s394_s1, 128, %s28_s13, [#allocation6]  }
  0x13   :  { %s248_s28 = scalar_lea.hbm %s393_s0, 128 }
  0x14   :  { %p249_p8 = scmp.ne.s32.totalorder %s393_s0, %s248_s28  ;;  %p252_p9 = scmp.lt.u32.totalorder %s248_s28, %s393_s0 }
  0x16   :  { %p254_p10 = pnand %p252_p9, %p249_p8 }
  0x18   :  { %257 = shalt.err (!%p254_p10)
}
  0x19   :  { %s258_s6 = scalar_lea.vmem %s18_s15, 128  ;;  %p263_p12 = scmp.lt.s32.totalorder %s18_s15, %s18_s15 }
  0x1a   :  { %p259_p11 = scmp.ne.s32.totalorder %s18_s15, %s258_s6  ;;  %p264_p13 = scmp.lt.s32.totalorder %s258_s6, %s258_s6 }
  0x1c   :  { %p265_p0 = por %p264_p13, %p263_p12 }
  0x1e   :  { %p266_p1 = pnand %p265_p0, %p259_p11 }
  0x20   :  { %269 = shalt.err (!%p266_p1)
}
  0x21   :  { %20 = dma.hbm_to_vmem [thread:$0]  %s393_s0, 128, %s18_s15, [#allocation3]  }
  0x22   :  { %s322_s8 = smov [#allocation7]   ;;  %s270_s12 = scalar_lea.hbm %s395_s2, 128 }
  0x23   :  { %s37_s9 = sshll.u32 %s322_s8, 4  ;;  %p271_p2 = scmp.ne.s32.totalorder %s395_s2, %s270_s12  ;;  %s38_s9 = int_to_ptr.vmem [resolvable:$true] %s37_s9 }
  0x24   :  { %p274_p3 = scmp.lt.u32.totalorder %s270_s12, %s395_s2 }
  0x26   :  { %p276_p4 = pnand %p274_p3, %p271_p2 }
  0x28   :  { %279 = shalt.err (!%p276_p4)
}
  0x29   :  { %s280_s18 = scalar_lea.vmem %s38_s9, 128  ;;  %p285_p6 = scmp.lt.s32.totalorder %s38_s9, %s38_s9 }
  0x2a   :  { %p281_p5 = scmp.ne.s32.totalorder %s38_s9, %s280_s18  ;;  %p286_p7 = scmp.lt.s32.totalorder %s280_s18, %s280_s18 }
  0x2c   :  { %p287_p8 = por %p286_p7, %p285_p6 }
  0x2e   :  { %p288_p9 = pnand %p287_p8, %p281_p5 }
  0x30   :  { %291 = shalt.err (!%p288_p9)
}
  0x31   :  { %40 = dma.hbm_to_vmem [thread:$0]  %s395_s2, 128, %s38_s9, [#allocation6]  }
  0x32   :  { %314 = dma.done.wait [#allocation3], 128  }
  0x33   :  { %315 = vsyncadd [#allocation3], 4294967168 }
  0x34   :  { %316 = dma.done.wait [#allocation6], 256  }
  0x35   :  { %317 = vsyncadd [#allocation6], 4294967040  ;;  %v65_v0 = vlaneseq  ;;  %v323_v1 = vmov 1983009808   ;;  %v50_v10 = vld [vmem:[#allocation2] sm:$0xff]  ;;  %v63_v11 = vld [vmem:[#allocation5] sm:$0xff] }
  0x36   :  { %v168_v2 = vunpack.c.l.s4 %v323_v1  ;;  %v109_v12 = vld [vmem:[#allocation7] sm:$0xff]  ;;  %v51_v17 = vunpack.c.0.s8 %v50_v10  ;;  %v52_v18 = vunpack.c.1.s8 %v50_v10  ;;  %v53_v32 = vunpack.c.2.s8 %v50_v10  ;;  %s324_s2 = smov [#allocation8]  }
  0x37   :  { %v66_v3 = vshrl.u32 %v65_v0, 7  ;;  %v54_v35 = vunpack.c.3.s8 %v50_v10  ;;  %s207_s19 = sshll.u32 %s324_s2, 4  ;;  %s208_s19 = int_to_ptr.vmem [resolvable:$true] %s207_s19 }
  0x38   :  { %v169_v4 = vunpack.c.0.s8 %v168_v2  ;;  %v55_v25 = vand.u32 255, %v51_v17  ;;  %v56_v26 = vand.u32 255, %v52_v18  ;;  %v57_v38 = vand.u32 255, %v53_v32  ;;  %s292_s20 = scalar_lea.vmem %s208_s19, 256  ;;  %p297_p11 = scmp.lt.s32.totalorder %s208_s19, %s208_s19 }
  0x39   :  { %v67_v5 = vsub.s32 0, %v66_v3  ;;  %v71_v6 = vsub.s32 1, %v66_v3  ;;  %v75_v7 = vsub.s32 2, %v66_v3  ;;  %v79_v8 = vsub.s32 3, %v66_v3  ;;  %p293_p10 = scmp.ne.s32.totalorder %s208_s19, %s292_s20  ;;  %p298_p12 = scmp.lt.s32.totalorder %s292_s20, %s292_s20 }
  0x3a   :  { %v83_v9 = vsub.s32 4, %v66_v3  ;;  %v172_v13 = vsub.s32 %v169_v4, %v66_v3  ;;  %v87_v14 = vsub.s32 5, %v66_v3  ;;  %v91_v15 = vsub.s32 6, %v66_v3 }
  0x3b   :  { %v95_v16 = vsub.s32 7, %v66_v3  ;;  %v68_v19 = vrot.slane %v63_v11, %v67_v5  ;;  %v72_v20 = vrot.slane %v63_v11, %v71_v6  ;;  %v76_v21 = vrot.slane %v63_v11, %v75_v7  ;;  %p299_p13 = por %p298_p12, %p297_p11 }
  0x3c   :  { %v80_v22 = vrot.slane %v63_v11, %v79_v8  ;;  %v114_v23 = vrot.slane %v109_v12, %v67_v5  ;;  %v118_v24 = vrot.slane %v109_v12, %v71_v6  ;;  %v122_v28 = vrot.slane %v109_v12, %v75_v7 }
  0x3d   :  { %v97_v27 = vcombine.low %v68_v19, %v72_v20  ;;  %v126_v30 = vrot.slane %v109_v12, %v79_v8  ;;  %v59_v33 = vcvt.s32.f32 %v55_v25  ;;  %v60_v34 = vcvt.s32.f32 %v56_v26  ;;  %p300_p0 = pnand %p299_p13, %p293_p10 }
  0x3e   :  { %v98_v29 = vcombine.low %v76_v21, %v80_v22  ;;  %v143_v31 = vcombine.low %v114_v23, %v118_v24  ;;  %v84_v36 = vrot.slane %v63_v11, %v83_v9  ;;  %v88_v39 = vrot.slane %v63_v11, %v87_v14 }
  0x3f   :  { %v144_v37 = vcombine.low %v122_v28, %v126_v30  ;;  %v92_v40 = vrot.slane %v63_v11, %v91_v15  ;;  %v105_v41 = vmul.f32 %v97_v27, %v59_v33  ;;  %v58_v43 = vand.u32 255, %v54_v35 }
  0x40   :  { %v106_v42 = vmul.f32 %v98_v29, %v60_v34  ;;  %v96_v44 = vrot.slane %v63_v11, %v95_v16  ;;  %v61_v45 = vcvt.s32.f32 %v57_v38  ;;  %v99_v46 = vcombine.low %v84_v36, %v88_v39 }
  0x41   :  { %v130_v47 = vrot.slane %v109_v12, %v83_v9  ;;  %v134_v48 = vrot.slane %v109_v12, %v87_v14  ;;  %v151_v49 = vadd.f32 %v143_v31, %v105_v41  ;;  %v62_v51 = vcvt.s32.f32 %v58_v43 }
  0x42   :  { %v152_v50 = vadd.f32 %v144_v37, %v106_v42  ;;  %v100_v52 = vcombine.low %v92_v40, %v96_v44  ;;  %v107_v53 = vmul.f32 %v99_v46, %v61_v45  ;;  %v138_v54 = vrot.slane %v109_v12, %v91_v15 }
  0x43   :  { %v142_v55 = vrot.slane %v109_v12, %v95_v16  ;;  %v145_v56 = vcombine.low %v130_v47, %v134_v48  ;;  %v217_v57 = vclamps-f32 %v151_v49, 5.0 }
  0x44   :  { %v218_v58 = vclamps-f32 %v152_v50, 5.0  ;;  %v108_v59 = vmul.f32 %v100_v52, %v62_v51 }
  0x45   :  { %v146_v60 = vcombine.low %v138_v54, %v142_v55  ;;  %v153_v61 = vadd.f32 %v145_v56, %v107_v53  ;;  %v173_v62 = vrot.slane %v217_v57, %v172_v13 }
  0x46   :  { %v180_v63 = vrot.slane %v218_v58, %v172_v13 }
  0x47   :  { %v154_v0 = vadd.f32 %v146_v60, %v108_v59  ;;  %v219_v1 = vclamps-f32 %v153_v61, 5.0 }
  0x48   :  { %v181_v2 = vcombine.low %v173_v62, %v180_v63 }
  0x49   :  { %v220_v3 = vclamps-f32 %v154_v0, 5.0  ;;  %v188_v4 = vrot.slane %v219_v1, %v172_v13 }
  0x4a   :  { %199 = vst [vmem:[#allocation8] sm:$0xff] %v181_v2 }
  0x4b   :  { %v195_v5 = vrot.slane %v220_v3, %v172_v13 }
  0x4d   :  { %v196_v6 = vcombine.low %v188_v4, %v195_v5 }
  0x4f   :  { %200 = vst [vmem:[#allocation8 + $0x8] sm:$0xff] %v196_v6 }
  0x50   :  { %303 = shalt.err (!%p300_p0)
}
  0x51   :  { %s304_s23 = scalar_lea.hbm %s396_s3, 256 }
  0x52   :  { %p305_p1 = scmp.ne.s32.totalorder %s396_s3, %s304_s23  ;;  %p308_p2 = scmp.lt.u32.totalorder %s304_s23, %s396_s3 }
  0x54   :  { %p310_p3 = pnand %p308_p2, %p305_p1 }
  0x56   :  { %313 = shalt.err (!%p310_p3)
}
  0x57   :  { %210 = dma.vmem_to_hbm [thread:$0]  %s208_s19, 256, %s396_s3, [#allocation4]  }
  0x58   :  { %318 = dma.done.wait [#allocation4], 256  }
  0x59   :  { %319 = vsyncadd [#allocation4], 4294967040 }
  0x5a   :  { %214 = vsyncpa [#allocation3], 1 }
  0x5b   :  { %215 = vsyncpa [#allocation6], 1 }
  0x5c   :  { %216 = vsyncpa [#allocation4], 1 }

</bundles_post_ra>
